<compile_context>
chip_gen: v5e
topology: v5e:2x2
jax: 0.10.0
libtpu: 0.0.40
codegen_flags: <defaults>
</compile_context>

<pallas_src>
import functools

import jax
import jax.numpy as jnp
from jax.experimental import pallas as pl
from jax.experimental.pallas import tpu as pltpu

_LANES = 128
_SUBLANES = 8
_NSPLIT = 2                      # leading "parallel" axis -> 2 TCs on v7x
_TARGET_BLOCK_BYTES = 4 * 1024 * 1024   # per operand per block


def _round_up(x, m):
    return ((x + m - 1) // m) * m


def _cdiv(a, b):
    return -(-a // b)


def _l1_partial_sum_kernel(pred_ref, targ_ref, out_ref):
    """Accumulate per-core partial sums of |pred - target| into an (8,128) tile.

    pred_ref / targ_ref : (block_rows, 128) lane-dense blocks.
    out_ref             : (8, 128) f32 accumulator, resident across the inner
                          ("arbitrary") grid axis for the current core.
    """
    i = pl.program_id(1)

    @pl.when(i == 0)
    def _():
        out_ref[...] = jnp.zeros_like(out_ref)

    # subtract/abs in the input dtype (native bf16 VPU on v6e/v7x), accumulate f32
    diff = jnp.abs(pred_ref[...] - targ_ref[...]).astype(jnp.float32)
    br = diff.shape[0]
    # Fold the whole block onto one (8,128) vreg tile: pure VPU adds, no
    # cross-lane reduce and no sub-lane masked stores in the hot loop.
    out_ref[...] += jnp.sum(diff.reshape(br // _SUBLANES, _SUBLANES, _LANES), axis=0)


def _l1_none_kernel(pred_ref, targ_ref, out_ref, *, loss_weight):
    diff = jnp.abs(pred_ref[...] - targ_ref[...])
    out_ref[...] = (loss_weight * diff.astype(jnp.float32)).astype(out_ref.dtype)


def _to_lane_dense(x, rows_padded):
    total = x.size
    flat = x.reshape(-1)
    pad = rows_padded * _LANES - total
    if pad:
        flat = jnp.pad(flat, (0, pad))
    return flat.reshape(rows_padded, _LANES)


def l1_loss(pred, target, weight=None, loss_weight=1.0, reduction='mean'):
    """Pallas implementation of L1Loss.forward(pred, target, weight=None)."""
    if reduction not in ('none', 'mean', 'sum'):
        raise ValueError(
            f'Unsupported reduction mode: {reduction}. Supported ones are: none | mean | sum')
    if weight is not None:
        # TODO(synk): element-wise `weight` path (basicsr weighted_loss normalization) not implemented.
        raise NotImplementedError('element-wise weight is not supported by this Pallas kernel')
    if pred.shape != target.shape:
        raise ValueError('pred and target must have the same shape')

    orig_shape = pred.shape
    total = int(pred.size)
    itemsize = jnp.dtype(pred.dtype).itemsize
    rows = _cdiv(total, _LANES)

    target_rows = max(
        _SUBLANES,
        ((_TARGET_BLOCK_BYTES // (_LANES * itemsize)) // _SUBLANES) * _SUBLANES)

    if reduction == 'none':
        block_rows = max(_SUBLANES, min(target_rows, _round_up(rows, _SUBLANES)))
        rows_padded = _round_up(rows, block_rows)
        nb = rows_padded // block_rows
        p2 = _to_lane_dense(pred, rows_padded)
        t2 = _to_lane_dense(target, rows_padded)
        out = pl.pallas_call(
            functools.partial(_l1_none_kernel, loss_weight=float(loss_weight)),
            out_shape=jax.ShapeDtypeStruct((rows_padded, _LANES), pred.dtype),
            grid=(nb,),
            in_specs=[pl.BlockSpec((block_rows, _LANES), lambda i: (i, 0)),
                      pl.BlockSpec((block_rows, _LANES), lambda i: (i, 0))],
            out_specs=pl.BlockSpec((block_rows, _LANES), lambda i: (i, 0)),
            compiler_params=pltpu.CompilerParams(
                dimension_semantics=("parallel",),
                vmem_limit_bytes=48 * 1024 * 1024),
        )(p2, t2)
        return out.reshape(-1)[:total].reshape(orig_shape)

    # 'mean' / 'sum': reduce |pred - target| to a scalar.
    rows_per_split = _round_up(_cdiv(rows, _NSPLIT), _SUBLANES)
    block_rows = max(_SUBLANES, min(target_rows, rows_per_split))
    rows_padded = _round_up(rows, _NSPLIT * block_rows)
    nb_inner = rows_padded // (_NSPLIT * block_rows)

    p2 = _to_lane_dense(pred, rows_padded)    # zero padding contributes |0-0|=0
    t2 = _to_lane_dense(target, rows_padded)

    partials = pl.pallas_call(
        _l1_partial_sum_kernel,
        out_shape=jax.ShapeDtypeStruct((_NSPLIT * _SUBLANES, _LANES), jnp.float32),
        grid=(_NSPLIT, nb_inner),
        in_specs=[
            pl.BlockSpec((block_rows, _LANES), lambda c, i: (c * nb_inner + i, 0)),
            pl.BlockSpec((block_rows, _LANES), lambda c, i: (c * nb_inner + i, 0)),
        ],
        out_specs=pl.BlockSpec((_SUBLANES, _LANES), lambda c, i: (c, 0)),
        compiler_params=pltpu.CompilerParams(
            dimension_semantics=("parallel", "arbitrary"),
            vmem_limit_bytes=48 * 1024 * 1024),
    )(p2, t2)

    total_abs = jnp.sum(partials)   # tiny (2*8, 128) final reduce outside the kernel
    if reduction == 'mean':
        loss = total_abs / jnp.float32(total)
    else:  # 'sum'
        loss = total_abs
    return jnp.float32(loss_weight) * loss


class L1Loss:
    """Pallas port of the PyTorch L1Loss module (forward only)."""

    def __init__(self, loss_weight=1.0, reduction='mean'):
        if reduction not in ('none', 'mean', 'sum'):
            raise ValueError(
                f'Unsupported reduction mode: {reduction}. Supported ones are: none | mean | sum')
        self.loss_weight = loss_weight
        self.reduction = reduction

    def __call__(self, pred, target, weight=None, **kwargs):
        return l1_loss(pred, target, weight=weight,
                       loss_weight=self.loss_weight, reduction=self.reduction)


if __name__ == "__main__":
    key = jax.random.PRNGKey(0)
    k1, k2 = jax.random.split(key)
    N, C, H, W = 2, 4, 16, 16
    pred = jax.random.normal(k1, (N, C, H, W), dtype=jnp.float32)
    target = jax.random.normal(k2, (N, C, H, W), dtype=jnp.float32)

    # mean (default module behavior)
    loss_mod = L1Loss(loss_weight=1.0, reduction='mean')
    loss = jax.block_until_ready(loss_mod(pred, target))
    ref = jnp.abs(pred - target).mean()
    assert jnp.allclose(loss, ref, rtol=1e-5, atol=1e-6), (loss, ref)

    # sum
    loss_sum = jax.block_until_ready(l1_loss(pred, target, reduction='sum'))
    ref_sum = jnp.abs(pred - target).sum()
    assert jnp.allclose(loss_sum, ref_sum, rtol=1e-5, atol=1e-4), (loss_sum, ref_sum)

    # none
    loss_none = jax.block_until_ready(l1_loss(pred, target, reduction='none'))
    ref_none = jnp.abs(pred - target)
    assert loss_none.shape == ref_none.shape
    assert jnp.allclose(loss_none, ref_none, rtol=1e-5, atol=1e-6)

    print("KERNEL_OK")
</pallas_src>

<mosaic_0001>
module attributes {stable_mosaic.version = 11 : i64} {
  func.func @_l1_partial_sum_kernel(%arg0: i32, %arg1: i32, %arg2: memref<8x128xf32, #tpu.memory_space<vmem>>, %arg3: memref<8x128xf32, #tpu.memory_space<vmem>>, %arg4: memref<8x128xf32, #tpu.memory_space<vmem>>) attributes {dimension_semantics = [#tpu.dimension_semantics<parallel>, #tpu.dimension_semantics<arbitrary>], iteration_bounds = array<i64: 2, 1>, scalar_prefetch = 0 : i64, scratch_operands = 0 : i64, tpu.core_type = #tpu.core_type<tc>, window_params = [{transform_indices = @transform_0, window_bounds = array<i64: 8, 128>}, {transform_indices = @transform_1, window_bounds = array<i64: 8, 128>}, {transform_indices = @transform_2, window_bounds = array<i64: 8, 128>}]} {
    %c0_i32 = arith.constant 0 : i32
    %0 = arith.cmpi eq, %arg1, %c0_i32 : i32
    %1 = arith.extui %0 : i1 to i32
    %c0_i32_0 = arith.constant 0 : i32
    %2 = arith.cmpi ne, %1, %c0_i32_0 : i32
    scf.if %2 {
      %cst_8 = arith.constant 0.000000e+00 : f32
      %12 = vector.broadcast %cst_8 : f32 to vector<8x128xf32>
      %c0_9 = arith.constant 0 : index
      %c0_10 = arith.constant 0 : index
      %13 = vector.load %arg4[%c0_9, %c0_10] : memref<8x128xf32, #tpu.memory_space<vmem>>, vector<8x128xf32>
      tpu.vector_store %arg4[%c0_9, %c0_10], %12 {strides = array<i32>} : memref<8x128xf32, #tpu.memory_space<vmem>>, vector<8x128xf32>,
    } else {
    }
    %c0 = arith.constant 0 : index
    %c0_1 = arith.constant 0 : index
    %3 = vector.load %arg2[%c0, %c0_1] : memref<8x128xf32, #tpu.memory_space<vmem>>, vector<8x128xf32>
    %c0_2 = arith.constant 0 : index
    %c0_3 = arith.constant 0 : index
    %4 = vector.load %arg3[%c0_2, %c0_3] : memref<8x128xf32, #tpu.memory_space<vmem>>, vector<8x128xf32>
    %5 = arith.subf %3, %4 : vector<8x128xf32>
    %6 = math.absf %5 : vector<8x128xf32>
    %c0_4 = arith.constant 0 : index
    %c0_5 = arith.constant 0 : index
    %7 = vector.load %arg4[%c0_4, %c0_5] : memref<8x128xf32, #tpu.memory_space<vmem>>, vector<8x128xf32>
    %8 = vector.shape_cast %6 : vector<8x128xf32> to vector<1x8x128xf32>
    %cst = arith.constant dense<0.000000e+00> : vector<8x128xf32>
    %9 = vector.multi_reduction <add>, %8, %cst [0] : vector<1x8x128xf32> to vector<8x128xf32>
    %10 = arith.addf %7, %9 : vector<8x128xf32>
    %c0_6 = arith.constant 0 : index
    %c0_7 = arith.constant 0 : index
    %11 = vector.load %arg4[%c0_6, %c0_7] : memref<8x128xf32, #tpu.memory_space<vmem>>, vector<8x128xf32>
    tpu.vector_store %arg4[%c0_6, %c0_7], %10 {strides = array<i32>} : memref<8x128xf32, #tpu.memory_space<vmem>>, vector<8x128xf32>,
    return
  }
  func.func @transform_0(%arg0: i32, %arg1: i32) -> (i32, i32) {
    %c1_i32 = arith.constant 1 : i32
    %0 = arith.muli %arg0, %c1_i32 : i32
    %1 = arith.addi %0, %arg1 : i32
    %c0_i32 = arith.constant 0 : i32
    %c0_i32_0 = arith.constant 0 : i32
    return %1, %c0_i32 : i32, i32
  }
  func.func @transform_1(%arg0: i32, %arg1: i32) -> (i32, i32) {
    %c1_i32 = arith.constant 1 : i32
    %0 = arith.muli %arg0, %c1_i32 : i32
    %1 = arith.addi %0, %arg1 : i32
    %c0_i32 = arith.constant 0 : i32
    %c0_i32_0 = arith.constant 0 : i32
    return %1, %c0_i32 : i32, i32
  }
  func.func @transform_2(%arg0: i32, %arg1: i32) -> (i32, i32) {
    %c0_i32 = arith.constant 0 : i32
    %c0_i32_0 = arith.constant 0 : i32
    return %arg0, %c0_i32 : i32, i32
  }
}

</mosaic_0001>

<bundles_post_ra>
// kernel: tpu_custom_call.1
= control target key start
LH: loop header
LB: loop body
LE: loop exit
PB: predicated region body
PF: predicated region fallthrough
CT: control target
= control target key end

     0   :  { %7 = vsyncpa [#allocation3], 0  ;;  %s727_s0 = inlined_call_operand.hbm [shape: f32[16,128], index: 0, kind: input, shape index: {}]   ;;  %s728_s1 = inlined_call_operand.hbm [shape: f32[16,128], index: 1, kind: input, shape index: {}]   ;;  %s729_s2 = inlined_call_operand.hbm [shape: f32[16,128], index: 2, kind: output, shape index: {}]  }
   0x1   :  { %9 = vsyncpa [#allocation3 + $0x1], 0 }
   0x2   :  { %10 = vsyncpa [#allocation6], 0 }
   0x3   :  { %12 = vsyncpa [#allocation6 + $0x1], 0 }
   0x4   :  { %13 = vsyncpa [#allocation4], 0 }
   0x5   :  { %15 = vsyncpa [#allocation4 + $0x1], 0  ;;  %s599_s9 = smov 0   ;;  %s601_s10 = smov 0  }
   0x6   :  { %s603_s11 = smov 0   ;;  %s605_s12 = smov 0  }
   0x7   :  { %s607_s13 = smov 0   ;;  %s609_s14 = smov 0  }
   0x8 LB: > { %s352_s15 = sadd.s32 4294967295, %s582_s14   ;;  %s353_s16 = sadd.s32 4294967294, %s582_s14   ;;  %s582_s14 = sphi %s609_s14, %s21_s14   ;;  %s578_s13 = sphi %s607_s13, %s738_s13   ;;  %s574_s12 = sphi %s605_s12, %s737_s12   ;;  %s570_s11 = sphi %s603_s11, %s736_s11   ;;  %s566_s10 = sphi %s601_s10, %s735_s10   ;;  %s562_s9 = sphi %s599_s9, %s734_s9  }
   0x9   : > { %s33_s17 = sadd.s32 1, %s578_s13  ;;  %s42_s18 = sadd.s32 1, %s570_s11 }
   0xa   : > { %p35_p0 = scmp.ge.s32.totalorder %s33_s17, 2  ;;  %p49_p1 = scmp.ne.s32.totalorder %s570_s11, %s566_s10 }
   0xb   : > { %p50_p2 = scmp.eq.s32.totalorder %s582_s14, 0  ;;  %p55_p3 = scmp.ne.s32.totalorder %s566_s10, %s562_s9 }
   0xc   : > { %s740_s17 = smov (%p35_p0, %s33_s17), 0  ;;  %p56_p5 = scmp.eq.s32.totalorder %s352_s15, 0 }
   0xd   : > { %p640_p4 = por %p50_p2, %p49_p1  ;;  %s39_s20 = ssub.s32 %s578_s13, %s740_s17 }
   0xe   : > { %p107_p6 = scmp.eq.s32.totalorder %s352_s15, 1  ;;  %p40_p7 = scmp.eq.s32.totalorder %s39_s20, 0 }
   0xf   : > { %p646_p8 = por %p56_p5, %p55_p3  ;;  %p113_p10 = scmp.eq.s32.totalorder %s353_s16, 1 }
  0x10   : > { %p650_p9 = por %p107_p6, %p49_p1  ;;  %p355_p12 = scmp.ge.s32.totalorder %s582_s14, 2 }
  0x11   : > { %s655_s23 = scalar_select %p40_p7, %s570_s11, %s42_s18  }
  0x12   : > { %p657_p11 = por %p113_p10, %p55_p3  ;;  %p385_p13 = scmp.lt.s32.totalorder %s582_s14, 2 }
  0x13   : > { %s133_s25 = sand.u32 1, %s570_s11   ;;  %s357_s27 = sshll.u32 %s578_s13, 3 }
  0x14   : > { %s356_s26 = sshll.u32 %s133_s25, 3  ;;  %s142_s30 = scalar_lea.hbm %s727_s0, %s357_s27 }
  0x15   : > { %s137_s3 = scalar_lea.vmem [#allocation2], %s356_s26  ;;  %s144_s5 = sshll.u32 %s142_s30, 4  ;;  %s145_s5 = int_to_ptr.hbm [resolvable:$true] %s144_s5 }
  0x16   : > { %s146_s4 = sshll.u32 %s137_s3, 4  ;;  %p375_p0 = pnand %p385_p13, %p640_p4  ;;  %s147_s4 = int_to_ptr.vmem [resolvable:$true] %s146_s4 }
  0x17   : > { %p360_p1 = scmp.ge.s32.totalorder %s582_s14, 1  ;;  %p171_p2 = scmp.lt.s32.totalorder %s582_s14, 3 }
  0x18   : > { %s134_s6 = scalar_lea.sflag [#allocation3], %s133_s25  ;;  %s162_s15 = scalar_lea.hbm %s728_s1, %s357_s27 }
  0x19   : > { %377 = dma.hbm_to_vmem [thread:$0]  (!%p375_p0), %s145_s5, 128, %s147_s4, %s134_s6  }
  0x1a   : > { %p172_p3 = pnand %p360_p1, %p171_p2  ;;  %s157_s16 = scalar_lea.vmem [#allocation5], %s356_s26 }
  0x1b   : > { %s166_s18 = sshll.u32 %s157_s16, 4  ;;  %s164_s20 = sshll.u32 %s162_s15, 4  ;;  %s167_s18 = int_to_ptr.vmem [resolvable:$true] %s166_s18  ;;  %s165_s20 = int_to_ptr.hbm [resolvable:$true] %s164_s20 }
  0x1c   : > { %s154_s28 = scalar_lea.sflag [#allocation6], %s133_s25  ;;  %175 = sbr.rel (%p172_p3) target bundleno = 51 (0x33), region = 28 }
  0x1d   : > { %380 = dma.hbm_to_vmem [thread:$0]  (!%p375_p0), %s165_s20, 128, %s167_s18, %s154_s28  }
  0x1e   : > { %s676_s19 = sand.u32 (!%p172_p3), 1, %s566_s10  }
  0x1f   : > { %s361_s29 = sshll.u32 (!%p172_p3), %s676_s19, 3  ;;  %s178_s30 = scalar_lea.sflag (!%p172_p3), [#allocation3], %s676_s19 }
  0x20   : > { %s181_s3 = scalar_lea.vmem (!%p172_p3), [#allocation2], %s361_s29 }
  0x21   : > { %549 = dma.done.wait (%p646_p8), %s178_s30, 128  }
  0x22   : > { %551 = vsyncadd (%p646_p8), %s178_s30, 4294967168  ;;  %s188_s26 = scalar_lea.sflag [#allocation6], %s676_s19  ;;  %s191_s25 = scalar_lea.vmem [#allocation5], %s361_s29 }
  0x23   : > { %553 = dma.done.wait (%p646_p8), %s188_s26, 128  }
  0x24   : > { %555 = vsyncadd (%p646_p8), %s188_s26, 4294967168  ;;  %s365_s27 = sshll.u32 %s574_s12, 3  ;;  %v225_v0 = vld [vmem:[%s181_s3] sm:$0xff]  ;;  %v226_v1 = vld [vmem:[%s191_s25] sm:$0xff]  ;;  %s217_s7 = scalar_lea.vmem [#allocation7], %s361_s29 }
  0x25   : > { %s244_s6 = scalar_lea.hbm %s729_s2, %s365_s27  ;;  %v227_v2 = vsub.f32 %v225_v0, %v226_v1  ;;  %s246_s8 = sshll.u32 %s217_s7, 4  ;;  %s247_s8 = int_to_ptr.vmem [resolvable:$true] %s246_s8 }
  0x26   : > { %s248_s15 = sshll.u32 %s244_s6, 4  ;;  %s234_s21 = scalar_lea.sflag [#allocation4], %s676_s19  ;;  %s249_s15 = int_to_ptr.hbm [resolvable:$true] %s248_s15 }
  0x27   : > { %v228_v3 = vand.u32 2147483647, %v227_v2  ;;  %s510_s16 = sshra.s32 %s249_s15, 4  ;;  %s516_s28 = scalar_lea.hbm %s729_s2, 16  ;;  %s511_s16 = int_to_ptr.hbm [resolvable:$true] %s510_s16 }
  0x28   : > { %s512_s18 = scalar_lea.hbm %s511_s16, 8  ;;  %p517_p7 = scmp.lt.s32.totalorder %s511_s16, %s729_s2 }
  0x29   : > { %232 = vst [vmem:[%s217_s7] sm:$0xff] %v228_v3  ;;  %p513_p4 = scmp.ne.s32.totalorder %s511_s16, %s512_s18  ;;  %p518_p8 = scmp.lt.s32.totalorder %s516_s28, %s512_s18 }
  0x2b   : > { %p514_p5 = pnand %p513_p4, %p650_p9  ;;  %p519_p10 = por %p518_p8, %p517_p7 }
  0x2d   : > { %p515_p6 = pneg %p514_p5 }
  0x2f   : > { %p520_p13 = pnand %p519_p10, %p515_p6 }
  0x31   : > { %523 = shalt.err (!%p520_p13)
}
  0x32   : > { %372 = dma.vmem_to_hbm [thread:$0]  (%p650_p9), %s247_s8, 128, %s249_s15, %s234_s21  }
  0x33 PF: > { %s260_s19 = sand.u32 1, %s562_s9   ;;  %p382_p0 = pnand %p355_p12, %p657_p11 }
  0x34   : > { %s261_s3 = scalar_lea.sflag [#allocation4], %s260_s19 }
  0x35   : > { %p383_p1 = pneg %p382_p0 }
  0x37   : > { %557 = dma.done.wait (%p383_p1), %s261_s3, 128  }
  0x38   : > { %559 = vsyncadd (%p383_p1), %s261_s3, 4294967168  ;;  %s21_s14 = sadd.s32 1, %s582_s14   ;;  %s734_s9 = smov %s566_s10 }
  0x39   : > { %p18_p2 = scmp.ge.s32.totalorder %s21_s14, 4   ;;  %s735_s10 = smov %s570_s11 }
  0x3a   : > { %s736_s11 = smov %s655_s23  ;;  %s737_s12 = smov %s578_s13 }
  0x3b   : > { %s738_s13 = smov %s740_s17  ;;  %20 = sbr.rel (!%p18_p2) target bundleno = 8 (0x8), region = 90 }
  0x40   :  { %267 = vsyncpa [#allocation3], 1 }
  0x41   :  { %269 = vsyncpa [#allocation3 + $0x1], 1 }
  0x42   :  { %270 = vsyncpa [#allocation6], 1 }
  0x43   :  { %272 = vsyncpa [#allocation6 + $0x1], 1 }
  0x44   :  { %273 = vsyncpa [#allocation4], 1 }
  0x45   :  { %275 = vsyncpa [#allocation4 + $0x1], 1 }

</bundles_post_ra>
